<compile_context>
chip_gen: v7x
topology: tpu7x:2x2x1
jax: 0.10.0
libtpu: 0.0.40
codegen_flags: <defaults>
</compile_context>

<pallas_src>
import jax
import jax.numpy as jnp
from jax.experimental import pallas as pl
from jax.experimental.pallas import tpu as pltpu

BN_EPS = 1e-5  # PyTorch BatchNorm1d default


def _bn_relu(h, gamma, beta, inv_n, mask):
    """Training-mode BatchNorm1d (biased var over lanes) fused with affine + ReLU."""
    s = jnp.sum(h, axis=-1, keepdims=True)
    ss = jnp.sum(h * h, axis=-1, keepdims=True)
    m = s * inv_n
    v = jnp.maximum(ss * inv_n - m * m, 0.0)          # guard tiny negative cancellation
    scale = gamma * jax.lax.rsqrt(v + BN_EPS)
    shift = beta - m * scale
    out = jnp.maximum(h * scale + shift, 0.0)
    if mask is not None:
        # keep padded lanes at exactly 0 so the next layer's stats stay correct
        out = jnp.where(mask, out, 0.0)
    return out


def _make_kpe_kernel(n_hidden, true_m, padded):
    """Build the kernel for a [3] + layers + [F] MLP with n_hidden BN+ReLU layers."""
    inv_n = 1.0 / float(true_m)

    def kernel(*refs):
        xy_ref, sc_ref = refs[0], refs[1]          # [2, Mp], [1, Mp]  (zero-padded)
        hid_refs = refs[2:2 + n_hidden]            # packed [C_i, C_{i-1}+2] = w|gamma|beta
        pout_ref = refs[2 + n_hidden]              # packed [F, C_last+1]  = w|bias
        out_ref = refs[3 + n_hidden]               # [F, Mp]

        mask = None
        if padded:
            mp = xy_ref.shape[-1]
            col = jax.lax.broadcasted_iota(jnp.int32, (1, mp), 1)
            mask = col < true_m

        # ---- layer 1: Conv1d(3 -> C1, k=1) as 3 VPU FMAs (K=3 would waste the MXU).
        #      Conv bias dropped: cancelled by training-mode BN mean subtraction.
        p1 = hid_refs[0]                           # [C1, 5] = wx|wy|ws|gamma|beta
        h = (p1[:, 0:1] * xy_ref[0:1, :]
             + p1[:, 1:2] * xy_ref[1:2, :]
             + p1[:, 2:3] * sc_ref[...])
        h = _bn_relu(h, p1[:, 3:4], p1[:, 4:5], inv_n, mask)

        # ---- hidden layers 2..n_hidden: bf16 MXU matmul + fused BN + ReLU (bias dropped).
        for p_ref in hid_refs[1:]:
            cin = p_ref.shape[1] - 2
            w = p_ref[:, :cin].astype(jnp.bfloat16)
            h = jnp.dot(w, h.astype(jnp.bfloat16),
                        preferred_element_type=jnp.float32)
            h = _bn_relu(h, p_ref[:, cin:cin + 1], p_ref[:, cin + 1:cin + 2],
                         inv_n, mask)

        # ---- final conv (no BN): keep its bias (nn.init.constant_ sets it to 0).
        cin = pout_ref.shape[1] - 1
        w = pout_ref[:, :cin].astype(jnp.bfloat16)
        o = jnp.dot(w, h.astype(jnp.bfloat16),
                    preferred_element_type=jnp.float32) + pout_ref[:, cin:cin + 1]
        out_ref[...] = o.astype(out_ref.dtype)

    return kernel


def init_params(key, feature_dim, layers):
    """PyTorch-style Conv1d init (uniform +-1/sqrt(fan_in)); BN gamma=1, beta=0."""
    chans = [3] + list(layers) + [feature_dim]
    ks = jax.random.split(key, 2 * (len(chans) - 1))
    p = {}
    for i in range(1, len(chans)):
        cin, cout = chans[i - 1], chans[i]
        bound = 1.0 / jnp.sqrt(cin)
        p[f"w{i}"] = jax.random.uniform(ks[2 * (i - 1)], (cout, cin),
                                        jnp.float32, -bound, bound)
        if i == len(chans) - 1:
            p[f"b{i}"] = jnp.zeros((cout, 1), jnp.float32)     # final bias = 0
        else:
            # b{i} is kept for parameter-set fidelity but is NOT fed to the kernel:
            # it is a mathematical no-op under training-mode BatchNorm.
            p[f"b{i}"] = jax.random.uniform(ks[2 * (i - 1) + 1], (cout, 1),
                                            jnp.float32, -bound, bound)
            p[f"g{i}"] = jnp.ones((cout, 1), jnp.float32)      # BN gamma
            p[f"be{i}"] = jnp.zeros((cout, 1), jnp.float32)    # BN beta
    return p


def keypoint_encoder(kpts, scores, params):
    """kpts: [B, N, 2] f32, scores: [B, N] f32 -> [B, feature_dim, N] f32."""
    B, N, _ = kpts.shape
    M = B * N
    Mp = ((M + 127) // 128) * 128                 # lane-align; padded cols stay 0

    n_conv = 1
    while f"w{n_conv + 1}" in params:
        n_conv += 1
    n_hidden = n_conv - 1
    assert n_hidden >= 1
    F = params[f"w{n_conv}"].shape[0]

    # input assembly: [2, M] coords + [1, M] scores (no [B,3,N] concat slab)
    xy = jnp.transpose(kpts.astype(jnp.float32), (2, 0, 1)).reshape(2, M)
    sc = scores.astype(jnp.float32).reshape(1, M)
    if Mp != M:
        xy = jnp.pad(xy, ((0, 0), (0, Mp - M)))
        sc = jnp.pad(sc, ((0, 0), (0, Mp - M)))

    # pack per-layer small tensors into one VMEM slab each
    packed = [jnp.concatenate([params[f"w{i}"], params[f"g{i}"], params[f"be{i}"]],
                              axis=1)
              for i in range(1, n_conv)]
    p_out = jnp.concatenate([params[f"w{n_conv}"], params[f"b{n_conv}"]], axis=1)

    args = (xy, sc, *packed, p_out)
    vmem = pl.BlockSpec(memory_space=pltpu.MemorySpace.VMEM)

    # TODO(synk): for very large B*N, tile M with a grid + two-phase BN stats
    # (re-deriving the tile for v7x's 64 MiB VMEM and adding a parallel axis /
    # cross-core stat exchange for its second TensorCore). Whole-slab residency
    # is comfortably within VMEM at real SuperGlue sizes (C<=256, B*N~4k).
    out = pl.pallas_call(
        _make_kpe_kernel(n_hidden=n_hidden, true_m=M, padded=(Mp != M)),
        out_shape=jax.ShapeDtypeStruct((F, Mp), jnp.float32),
        in_specs=[vmem] * len(args),
        out_specs=vmem,
    )(*args)

    # back to PyTorch output layout [B, feature_dim, N]
    out = out[:, :M].reshape(F, B, N)
    return jnp.transpose(out, (1, 0, 2))


if __name__ == "__main__":
    key = jax.random.PRNGKey(0)
    k_kpts, k_scores, k_params = jax.random.split(key, 3)

    B, N = 2, 64                 # M = B*N = 128 -> lane aligned, no padding path
    feature_dim = 32
    layers = [32, 32]

    kpts = jax.random.uniform(k_kpts, (B, N, 2), jnp.float32, -1.0, 1.0)
    scores = jax.random.uniform(k_scores, (B, N), jnp.float32, 0.0, 1.0)
    params = init_params(k_params, feature_dim, layers)

    out = keypoint_encoder(kpts, scores, params)
    jax.block_until_ready(out)
    assert out.shape == (B, feature_dim, N)
    assert bool(jnp.all(jnp.isfinite(out)))
    print("KERNEL_OK")
</pallas_src>

<mosaic_0001>
module attributes {stable_mosaic.version = 11 : i64} {
  func.func @kernel(%arg0: memref<2x128xf32, #tpu.memory_space<vmem>>, %arg1: memref<1x128xf32, #tpu.memory_space<vmem>>, %arg2: memref<32x5xf32, #tpu.memory_space<vmem>>, %arg3: memref<32x34xf32, #tpu.memory_space<vmem>>, %arg4: memref<32x33xf32, #tpu.memory_space<vmem>>, %arg5: memref<32x128xf32, #tpu.memory_space<vmem>>) attributes {dimension_semantics = [], scalar_prefetch = 0 : i64, scratch_operands = 0 : i64, tpu.core_type = #tpu.core_type<tc>} {
    %c0 = arith.constant 0 : index
    %c0_0 = arith.constant 0 : index
    %0 = vector.load %arg2[%c0, %c0_0] : memref<32x5xf32, #tpu.memory_space<vmem>>, vector<32x1xf32>
    %c0_1 = arith.constant 0 : index
    %c0_2 = arith.constant 0 : index
    %1 = vector.load %arg0[%c0_1, %c0_2] : memref<2x128xf32, #tpu.memory_space<vmem>>, vector<1x128xf32>
    %2 = vector.broadcast %0 : vector<32x1xf32> to vector<32x128xf32>
    %3 = vector.broadcast %1 : vector<1x128xf32> to vector<32x128xf32>
    %4 = arith.mulf %2, %3 : vector<32x128xf32>
    %c0_3 = arith.constant 0 : index
    %c1 = arith.constant 1 : index
    %5 = vector.load %arg2[%c0_3, %c1] : memref<32x5xf32, #tpu.memory_space<vmem>>, vector<32x1xf32>
    %c1_4 = arith.constant 1 : index
    %c0_5 = arith.constant 0 : index
    %6 = vector.load %arg0[%c1_4, %c0_5] : memref<2x128xf32, #tpu.memory_space<vmem>>, vector<1x128xf32>
    %7 = vector.broadcast %5 : vector<32x1xf32> to vector<32x128xf32>
    %8 = vector.broadcast %6 : vector<1x128xf32> to vector<32x128xf32>
    %9 = arith.mulf %7, %8 : vector<32x128xf32>
    %10 = arith.addf %4, %9 : vector<32x128xf32>
    %c0_6 = arith.constant 0 : index
    %c2 = arith.constant 2 : index
    %11 = vector.load %arg2[%c0_6, %c2] : memref<32x5xf32, #tpu.memory_space<vmem>>, vector<32x1xf32>
    %c0_7 = arith.constant 0 : index
    %c0_8 = arith.constant 0 : index
    %12 = vector.load %arg1[%c0_7, %c0_8] : memref<1x128xf32, #tpu.memory_space<vmem>>, vector<1x128xf32>
    %13 = vector.broadcast %11 : vector<32x1xf32> to vector<32x128xf32>
    %14 = vector.broadcast %12 : vector<1x128xf32> to vector<32x128xf32>
    %15 = arith.mulf %13, %14 : vector<32x128xf32>
    %16 = arith.addf %10, %15 : vector<32x128xf32>
    %c0_9 = arith.constant 0 : index
    %c3 = arith.constant 3 : index
    %17 = vector.load %arg2[%c0_9, %c3] : memref<32x5xf32, #tpu.memory_space<vmem>>, vector<32x1xf32>
    %c0_10 = arith.constant 0 : index
    %c4 = arith.constant 4 : index
    %18 = vector.load %arg2[%c0_10, %c4] : memref<32x5xf32, #tpu.memory_space<vmem>>, vector<32x1xf32>
    %cst = arith.constant dense<0.000000e+00> : vector<32xf32>
    %19 = vector.multi_reduction <add>, %16, %cst [1] : vector<32x128xf32> to vector<32xf32>
    %20 = vector.shape_cast %19 : vector<32xf32> to vector<32x1xf32>
    %21 = arith.mulf %16, %16 : vector<32x128xf32>
    %cst_11 = arith.constant dense<0.000000e+00> : vector<32xf32>
    %22 = vector.multi_reduction <add>, %21, %cst_11 [1] : vector<32x128xf32> to vector<32xf32>
    %23 = vector.shape_cast %22 : vector<32xf32> to vector<32x1xf32>
    %cst_12 = arith.constant 7.812500e-03 : f32
    %24 = vector.broadcast %cst_12 : f32 to vector<32x1xf32>
    %25 = arith.mulf %20, %24 : vector<32x1xf32>
    %cst_13 = arith.constant 7.812500e-03 : f32
    %26 = vector.broadcast %cst_13 : f32 to vector<32x1xf32>
    %27 = arith.mulf %23, %26 : vector<32x1xf32>
    %28 = arith.mulf %25, %25 : vector<32x1xf32>
    %29 = arith.subf %27, %28 : vector<32x1xf32>
    %cst_14 = arith.constant 0.000000e+00 : f32
    %30 = vector.broadcast %cst_14 : f32 to vector<32x1xf32>
    %31 = arith.maximumf %29, %30 : vector<32x1xf32>
    %cst_15 = arith.constant 9.99999974E-6 : f32
    %32 = vector.broadcast %cst_15 : f32 to vector<32x1xf32>
    %33 = arith.addf %31, %32 : vector<32x1xf32>
    %34 = math.rsqrt %33 : vector<32x1xf32>
    %35 = arith.mulf %17, %34 : vector<32x1xf32>
    %36 = arith.mulf %25, %35 : vector<32x1xf32>
    %37 = arith.subf %18, %36 : vector<32x1xf32>
    %38 = vector.broadcast %35 : vector<32x1xf32> to vector<32x128xf32>
    %39 = arith.mulf %16, %38 : vector<32x128xf32>
    %40 = vector.broadcast %37 : vector<32x1xf32> to vector<32x128xf32>
    %41 = arith.addf %39, %40 : vector<32x128xf32>
    %cst_16 = arith.constant 0.000000e+00 : f32
    %42 = vector.broadcast %cst_16 : f32 to vector<32x128xf32>
    %43 = arith.maximumf %41, %42 : vector<32x128xf32>
    %c0_17 = arith.constant 0 : index
    %c0_18 = arith.constant 0 : index
    %44 = vector.load %arg3[%c0_17, %c0_18] : memref<32x34xf32, #tpu.memory_space<vmem>>, vector<32x32xf32>
    %45 = arith.truncf %44 : vector<32x32xf32> to vector<32x32xbf16>
    %46 = arith.truncf %43 : vector<32x128xf32> to vector<32x128xbf16>
    %cst_19 = arith.constant dense<0.000000e+00> : vector<32x128xf32>
    %47 = tpu.matmul %45, %46, %cst_19 {dimension_numbers = #tpu.dot_dimension_numbers<[1], [0], [0], [1], [0, 0, 1, 1], [], []>} : vector<32x32xbf16>, vector<32x128xbf16>, vector<32x128xf32> -> vector<32x128xf32>
    %c0_20 = arith.constant 0 : index
    %c32 = arith.constant 32 : index
    %48 = vector.load %arg3[%c0_20, %c32] : memref<32x34xf32, #tpu.memory_space<vmem>>, vector<32x1xf32>
    %c0_21 = arith.constant 0 : index
    %c33 = arith.constant 33 : index
    %49 = vector.load %arg3[%c0_21, %c33] : memref<32x34xf32, #tpu.memory_space<vmem>>, vector<32x1xf32>
    %cst_22 = arith.constant dense<0.000000e+00> : vector<32xf32>
    %50 = vector.multi_reduction <add>, %47, %cst_22 [1] : vector<32x128xf32> to vector<32xf32>
    %51 = vector.shape_cast %50 : vector<32xf32> to vector<32x1xf32>
    %52 = arith.mulf %47, %47 : vector<32x128xf32>
    %cst_23 = arith.constant dense<0.000000e+00> : vector<32xf32>
    %53 = vector.multi_reduction <add>, %52, %cst_23 [1] : vector<32x128xf32> to vector<32xf32>
    %54 = vector.shape_cast %53 : vector<32xf32> to vector<32x1xf32>
    %cst_24 = arith.constant 7.812500e-03 : f32
    %55 = vector.broadcast %cst_24 : f32 to vector<32x1xf32>
    %56 = arith.mulf %51, %55 : vector<32x1xf32>
    %cst_25 = arith.constant 7.812500e-03 : f32
    %57 = vector.broadcast %cst_25 : f32 to vector<32x1xf32>
    %58 = arith.mulf %54, %57 : vector<32x1xf32>
    %59 = arith.mulf %56, %56 : vector<32x1xf32>
    %60 = arith.subf %58, %59 : vector<32x1xf32>
    %cst_26 = arith.constant 0.000000e+00 : f32
    %61 = vector.broadcast %cst_26 : f32 to vector<32x1xf32>
    %62 = arith.maximumf %60, %61 : vector<32x1xf32>
    %cst_27 = arith.constant 9.99999974E-6 : f32
    %63 = vector.broadcast %cst_27 : f32 to vector<32x1xf32>
    %64 = arith.addf %62, %63 : vector<32x1xf32>
    %65 = math.rsqrt %64 : vector<32x1xf32>
    %66 = arith.mulf %48, %65 : vector<32x1xf32>
    %67 = arith.mulf %56, %66 : vector<32x1xf32>
    %68 = arith.subf %49, %67 : vector<32x1xf32>
    %69 = vector.broadcast %66 : vector<32x1xf32> to vector<32x128xf32>
    %70 = arith.mulf %47, %69 : vector<32x128xf32>
    %71 = vector.broadcast %68 : vector<32x1xf32> to vector<32x128xf32>
    %72 = arith.addf %70, %71 : vector<32x128xf32>
    %cst_28 = arith.constant 0.000000e+00 : f32
    %73 = vector.broadcast %cst_28 : f32 to vector<32x128xf32>
    %74 = arith.maximumf %72, %73 : vector<32x128xf32>
    %c0_29 = arith.constant 0 : index
    %c0_30 = arith.constant 0 : index
    %75 = vector.load %arg4[%c0_29, %c0_30] : memref<32x33xf32, #tpu.memory_space<vmem>>, vector<32x32xf32>
    %76 = arith.truncf %75 : vector<32x32xf32> to vector<32x32xbf16>
    %77 = arith.truncf %74 : vector<32x128xf32> to vector<32x128xbf16>
    %cst_31 = arith.constant dense<0.000000e+00> : vector<32x128xf32>
    %78 = tpu.matmul %76, %77, %cst_31 {dimension_numbers = #tpu.dot_dimension_numbers<[1], [0], [0], [1], [0, 0, 1, 1], [], []>} : vector<32x32xbf16>, vector<32x128xbf16>, vector<32x128xf32> -> vector<32x128xf32>
    %c0_32 = arith.constant 0 : index
    %c32_33 = arith.constant 32 : index
    %79 = vector.load %arg4[%c0_32, %c32_33] : memref<32x33xf32, #tpu.memory_space<vmem>>, vector<32x1xf32>
    %80 = vector.broadcast %79 : vector<32x1xf32> to vector<32x128xf32>
    %81 = arith.addf %78, %80 : vector<32x128xf32>
    %c0_34 = arith.constant 0 : index
    %c0_35 = arith.constant 0 : index
    %82 = vector.load %arg5[%c0_34, %c0_35] : memref<32x128xf32, #tpu.memory_space<vmem>>, vector<32x128xf32>
    tpu.vector_store %arg5[%c0_34, %c0_35], %81 {strides = array<i32>} : memref<32x128xf32, #tpu.memory_space<vmem>>, vector<32x128xf32>,
    return
  }
}

</mosaic_0001>

<bundles_post_ra>
// kernel: tpu_custom_call.1
= control target key start
LH: loop header
LB: loop body
LE: loop exit
PB: predicated region body
PF: predicated region fallthrough
CT: control target
= control target key end

     0   :  { %10 = vsyncpa [#allocation3], 0  ;;  %s894_s0 = inlined_call_operand.vmem [shape: f32[2,128], index: 0, kind: input, shape index: {}]   ;;  %s895_s1 = inlined_call_operand.vmem [shape: f32[1,128], index: 1, kind: input, shape index: {}]   ;;  %s896_s2 = inlined_call_operand.vmem [shape: f32[32,5], index: 2, kind: input, shape index: {}]   ;;  %s897_s3 = inlined_call_operand.vmem [shape: f32[32,34], index: 3, kind: input, shape index: {}]   ;;  %s898_s4 = inlined_call_operand.hbm [shape: f32[32,33], index: 4, kind: input, shape index: {}]   ;;  %s899_s5 = inlined_call_operand.hbm [shape: f32[32,128], index: 5, kind: output, shape index: {}]  }
   0x1   :  { %11 = vsyncpa [#allocation4], 0  ;;  %s677_s18 = smov [#allocation2]   ;;  %s629_s22 = scalar_lea.hbm %s898_s4, 512 }
   0x2   :  { %s25_s19 = sshll.u32 %s677_s18, 4  ;;  %p630_p0 = scmp.ne.s32.totalorder %s898_s4, %s629_s22  ;;  %s26_s19 = int_to_ptr.vmem [resolvable:$true] %s25_s19 }
   0x3   :  { %p633_p1 = scmp.lt.u32.totalorder %s629_s22, %s898_s4 }
   0x5   :  { %p635_p2 = pnand %p633_p1, %p630_p0 }
   0x7   :  { %638 = shalt.err (!%p635_p2)
}
   0x8   :  { %s639_s27 = scalar_lea.vmem %s26_s19, 512  ;;  %p644_p4 = scmp.lt.s32.totalorder %s26_s19, %s26_s19 }
   0x9   :  { %p640_p3 = scmp.ne.s32.totalorder %s26_s19, %s639_s27  ;;  %p645_p5 = scmp.lt.s32.totalorder %s639_s27, %s639_s27 }
   0xb   :  { %p646_p6 = por %p645_p5, %p644_p4 }
   0xd   :  { %p647_p7 = pnand %p646_p6, %p640_p3 }
   0xf   :  { %650 = shalt.err (!%p647_p7)
}
  0x10   :  { %s678_s28 = smov 128   ;;  %s679_s29 = smov 8  }
  0x11   :  { %31 = dma.hbm_to_vmem [thread:$0]  %s898_s4, 512, %s26_s19, [#allocation3], %s678_s28, %s678_s28, %s679_s29  }
  0x12   :  { %673 = dma.done.wait [#allocation3], 512  }
  0x13   :  { %674 = vsyncadd [#allocation3], 4294966784  ;;  %v680_v0 = vmov 1   ;;  %v681_v1 = vmov 0   ;;  %v737_v2 = vld [vmem:[%s896_s2] sm:$0xff]  ;;  %v744_v3 = vld [vmem:[%s896_s2 + $0x8] sm:$0xff] }
  0x14   :  { %597 = vset.pattern.permute.xlu1 %v680_v0  ;;  %596 = vset.pattern.permute.xlu0 %v681_v1  ;;  %v751_v4 = vld [vmem:[%s896_s2 + $0x18] sm:$0xff]  ;;  %v682_v5 = vmov 2   ;;  %v758_v6 = vld [vmem:[%s896_s2 + $0x10] sm:$0xff]  ;;  %v554_v11 = vld [vmem:[%s894_s0 + $0x1] ss:$0 sm:$0xff]  ;;  %v683_v46 = vmov 3  }
  0x15   :  { %71 = vperm.xlu1 %597, %v737_v2   ;;  %43 = vperm.xlu0 %596, %v737_v2   ;;  %v553_v12 = vld [vmem:[%s894_s0] ss:$0 sm:$0xff]  ;;  %s684_s0 = smov 1   ;;  %vm265_vm0 = vcmask 261120  }
  0x16   :  { %v555_v15 = vld [vmem:[%s895_s1] ss:$0 sm:$0xff] }
  0x19   :  { %75 = vperm.xlu1 %597, %v744_v3   ;;  %48 = vperm.xlu0 %596, %v744_v3  }
  0x1d   :  { %598 = vset.pattern.permute.xlu1 %v682_v5  ;;  %58 = vperm.xlu0 %596, %v751_v4  }
  0x1e   :  { %104 = vperm.xlu1 %598, %v744_v3  }
  0x21   :  { %600 = vset.pattern.permute.xlu0 %v682_v5 }
  0x22   :  { %599 = vset.pattern.permute.xlu1 %v681_v1  ;;  %100 = vperm.xlu0 %600, %v737_v2  }
  0x23   :  { %53 = vperm.xlu1 %599, %v758_v6  }
  0x26   :  { %108 = vperm.xlu0 %600, %v758_v6  }
  0x27   :  { %601 = vset.pattern.permute.xlu1 %v680_v0 }
  0x28   :  { %79 = vperm.xlu1 %601, %v758_v6  }
  0x2a   :  { %604 = vset.pattern.permute.xlu0 %v683_v46 }
  0x2c   :  { %83 = vperm.xlu1 %601, %v751_v4  }
  0x30   :  { %602 = vset.pattern.permute.xlu1 %v682_v5 }
  0x31   :  { %112 = vperm.xlu1 %602, %v751_v4  }
  0x35   :  { %603 = vset.pattern.permute.xlu1 %v683_v46 }
  0x94   :  { %v72_v7 = vpop.permute.xlu1 %71  ;;  %v44_v8 = vpop.permute.xlu0 %43 }
  0x95   :  { %v90_v18 = vmul.f32 %v554_v11, %v72_v7  ;;  %v65_v19 = vmul.f32 %v553_v12, %v44_v8 }
  0x97   :  { %v94_v24 = vadd.f32 %v90_v18, %v65_v19 }
  0x98   :  { %v76_v9 = vpop.permute.xlu1 %75  ;;  %v49_v10 = vpop.permute.xlu0 %48 }
  0x99   :  { %v91_v13 = vmul.f32 %v554_v11, %v76_v9  ;;  %v66_v14 = vmul.f32 %v553_v12, %v49_v10 }
  0x9b   :  { %v95_v20 = vadd.f32 %v91_v13, %v66_v14 }
  0x9c   :  { %v59_v16 = vpop.permute.xlu0 %58 }
  0x9d   :  { %v105_v17 = vpop.permute.xlu1 %104  ;;  %v68_v37 = vmul.f32 %v553_v12, %v59_v16 }
  0x9e   :  { %v122_v21 = vmul.f32 %v555_v15, %v105_v17 }
  0xa0   :  { %v775_v22 = vadd.f32 %v122_v21, %v95_v20 }
  0xa1   :  { %v101_v23 = vpop.permute.xlu0 %100 }
  0xa2   :  { %v121_v25 = vmul.f32 %v555_v15, %v101_v23  ;;  %v54_v26 = vpop.permute.xlu1 %53  ;;  %131 = vadd.xlane.f32.xlu0 %v775_v22  ;;  %v138_v44 = vmul.f32 %v775_v22, %v775_v22 }
  0xa3   :  { %v67_v30 = vmul.f32 %v553_v12, %v54_v26 }
  0xa4   :  { %v778_v27 = vadd.f32 %v121_v25, %v94_v24 }
  0xa5   :  { %v109_v28 = vpop.permute.xlu0 %108 }
  0xa6   :  { %129 = vadd.xlane.f32.xlu1 %v778_v27  ;;  %v123_v32 = vmul.f32 %v555_v15, %v109_v28  ;;  %v137_v39 = vmul.f32 %v778_v27, %v778_v27 }
  0xa7   :  { %v80_v29 = vpop.permute.xlu1 %79 }
  0xa8   :  { %v92_v31 = vmul.f32 %v554_v11, %v80_v29 }
  0xaa   :  { %v96_v33 = vadd.f32 %v92_v31, %v67_v30 }
  0xab   :  { %v84_v34 = vpop.permute.xlu1 %83 }
  0xac   :  { %v781_v35 = vadd.f32 %v123_v32, %v96_v33  ;;  %v93_v36 = vmul.f32 %v554_v11, %v84_v34  ;;  %v685_v33 = vmov 4  }
  0xae   :  { %133 = vadd.xlane.f32.xlu0 %v781_v35  ;;  %v97_v40 = vadd.f32 %v93_v36, %v68_v37  ;;  %v139_v43 = vmul.f32 %v781_v35, %v781_v35 }
  0xb0   :  { %v113_v38 = vpop.permute.xlu1 %112 }
  0xb1   :  { %v124_v41 = vmul.f32 %v555_v15, %v113_v38 }
  0xb2   :  { %141 = vadd.xlane.f32.xlu0 %v137_v39 }
  0xb3   :  { %v786_v42 = vadd.f32 %v124_v41, %v97_v40 }
  0xb5   :  { %135 = vadd.xlane.f32.xlu1 %v786_v42  ;;  %v140_v45 = vmul.f32 %v786_v42, %v786_v42 }
  0xb6   :  { %145 = vadd.xlane.f32.xlu0 %v139_v43 }
  0xb9   :  { %143 = vadd.xlane.f32.xlu1 %v138_v44  ;;  %v810_v44 = vld [vmem:[%s897_s3] sm:$0xff] }
  0xbd   :  { %147 = vadd.xlane.f32.xlu1 %v140_v45 }
 0x12f   :  { %v132_v47 = vpop.xlane.xlu0 %131 }
 0x130   :  { %v150_v57 = vmul.f32 0.0078125, %v132_v47 }
 0x132   :  { %v158_v1 = vmul.f32 %v150_v57, %v150_v57 }
 0x133   :  { %v130_v48 = vpop.xlane.xlu1 %129 }
 0x134   :  { %v149_v50 = vmul.f32 0.0078125, %v130_v48 }
 0x136   :  { %v157_v52 = vmul.f32 %v149_v50, %v149_v50 }
 0x13b   :  { %v134_v49 = vpop.xlane.xlu0 %133 }
 0x13c   :  { %v151_v53 = vmul.f32 0.0078125, %v134_v49 }
 0x13e   :  { %v159_v59 = vmul.f32 %v151_v53, %v151_v53 }
 0x13f   :  { %v142_v51 = vpop.xlane.xlu0 %141 }
 0x140   :  { %v153_v54 = vmul.f32 0.0078125, %v142_v51 }
 0x142   :  { %v161_v55 = vsub.f32 %v153_v54, %v157_v52  ;;  %v136_v56 = vpop.xlane.xlu1 %135 }
 0x143   :  { %v146_v58 = vpop.xlane.xlu0 %145  ;;  %v152_v5 = vmul.f32 0.0078125, %v136_v56 }
 0x144   :  { %v165_v60 = vmax.f32 %v161_v55, 0.0  ;;  %v155_v61 = vmul.f32 0.0078125, %v146_v58 }
 0x145   :  { %v160_v12 = vmul.f32 %v152_v5, %v152_v5 }
 0x146   :  { %v169_v62 = vadd.f32 1e-05, %v165_v60  ;;  %v163_v63 = vsub.f32 %v155_v61, %v159_v59  ;;  %v144_v0 = vpop.xlane.xlu1 %143 }
 0x147   :  { %v154_v7 = vmul.f32 0.0078125, %v144_v0 }
 0x148   :  { %613 = vrsqrt.f32 %v169_v62  ;;  %v167_v8 = vmax.f32 %v163_v63, 0.0 }
 0x149   :  { %v162_v9 = vsub.f32 %v154_v7, %v158_v1 }
 0x14a   :  { %v171_v10 = vadd.f32 1e-05, %v167_v8  ;;  %v148_v11 = vpop.xlane.xlu1 %147 }
 0x14b   :  { %v166_v13 = vmax.f32 %v162_v9, 0.0  ;;  %v156_v14 = vmul.f32 0.0078125, %v148_v11 }
 0x14c   :  { %615 = vrsqrt.f32 %v171_v10 }
 0x14d   :  { %v170_v15 = vadd.f32 1e-05, %v166_v13  ;;  %v164_v16 = vsub.f32 %v156_v14, %v160_v12  ;;  %v686_v12 = vmov 32  }
 0x14f   :  { %617 = vrsqrt.f32 %v170_v15  ;;  %v168_v17 = vmax.f32 %v164_v16, 0.0 }
 0x151   :  { %v172_v18 = vadd.f32 1e-05, %v168_v17 }
 0x152   :  { %v614_v19 = vpop.eup %613 }
 0x153   :  { %619 = vrsqrt.f32 %v172_v18  ;;  %v177_v20 = vmul.f32 %v614_v19, %v737_v2 }
 0x155   :  { %v181_v21 = vmul.f32 %v177_v20, %v149_v50 }
 0x156   :  { %v616_v23 = vpop.eup %615 }
 0x157   :  { %189 = vrot.lane.b32.xlu0 %v181_v21, %s684_s0  ;;  %v179_v28 = vmul.f32 %v616_v23, %v758_v6 }
 0x159   :  { %v618_v24 = vpop.eup %617  ;;  %v183_v32 = vmul.f32 %v179_v28, %v151_v53 }
 0x15a   :  { %v178_v25 = vmul.f32 %v618_v24, %v744_v3 }
 0x15c   :  { %v182_v26 = vmul.f32 %v178_v25, %v150_v57 }
 0x15d   :  { %v620_v29 = vpop.eup %619 }
 0x15e   :  { %191 = vrot.lane.b32.xlu1 %v182_v26, %s684_s0  ;;  %v180_v30 = vmul.f32 %v620_v29, %v751_v4 }
 0x160   :  { %v184_v31 = vmul.f32 %v180_v30, %v152_v5 }
 0x162   :  { %195 = vrot.lane.b32.xlu0 %v184_v31, %s684_s0  ;;  %193 = vrot.lane.b32.xlu1 %v183_v32, %s684_s0 }
 0x166   :  { %212 = vperm.xlu0 %604, %v178_v25   ;;  %207 = vperm.xlu1 %603, %v177_v20  }
 0x16a   :  { %217 = vperm.xlu0 %604, %v179_v28   ;;  %222 = vperm.xlu1 %603, %v180_v30  }
 0x16e   :  { %605 = vset.pattern.permute.xlu1 %v685_v33  ;;  %606 = vset.pattern.permute.xlu0 %v685_v33 }
 0x1c9   :  { %v190_v34 = vpop.permute.xlu0 %189 }
 0x1ca   :  { %v201_v36 = vsub.f32 %v737_v2, %v190_v34  ;;  %v815_v2 = vld [vmem:[%s897_s3 + $0x8] sm:$0xff] }
 0x1cc   :  { %231 = vperm.xlu1 %605, %v201_v36  }
 0x1d0   :  { %v192_v37 = vpop.permute.xlu1 %191 }
 0x1d1   :  { %v202_v38 = vsub.f32 %v744_v3, %v192_v37  ;;  %v261_v3 = vpack.c.bf16 %v815_v2, %v810_v44 }
 0x1d3   :  { %236 = vperm.xlu1 %605, %v202_v38   ;;  %572 = vmatprep.mubr.msk.bf16.mxu0 %vm265_vm0, %v261_v3 }
 0x1d4   :  { %v194_v39 = vpop.permute.xlu1 %193  ;;  %v196_v40 = vpop.permute.xlu0 %195 }
 0x1d5   :  { %v203_v41 = vsub.f32 %v758_v6, %v194_v39  ;;  %v204_v43 = vsub.f32 %v751_v4, %v196_v40 }
 0x1d7   :  { %241 = vperm.xlu0 %606, %v203_v41   ;;  %246 = vperm.xlu1 %605, %v204_v43  }
 0x1db   :  { %608 = vset.pattern.permute.xlu0 %v686_v12  ;;  %607 = vset.pattern.permute.xlu1 %v686_v12 }
 0x1e5   :  { %v208_v6 = vpop.permute.xlu1 %207  ;;  %v213_v45 = vpop.permute.xlu0 %212 }
 0x1e6   :  { %v225_v47 = vmul.f32 %v208_v6, %v778_v27  ;;  %v226_v48 = vmul.f32 %v213_v45, %v775_v22  ;;  %v827_v22 = vld [vmem:[%s897_s3 + $0x10] sm:$0xff]  ;;  %v832_v27 = vld [vmem:[%s897_s3 + $0x18] sm:$0xff]  ;;  %s688_s3 = smov [#allocation5]  }
 0x1e7   :  { %s541_s26 = sshll.u32 %s688_s3, 4  ;;  %s542_s26 = int_to_ptr.vmem [resolvable:$true] %s541_s26 }
 0x1e8   :  { %s651_s27 = scalar_lea.vmem %s542_s26, 512  ;;  %p656_p9 = scmp.lt.s32.totalorder %s542_s26, %s542_s26 }
 0x1e9   :  { %v223_v4 = vpop.permute.xlu1 %222  ;;  %v218_v50 = vpop.permute.xlu0 %217  ;;  %p652_p8 = scmp.ne.s32.totalorder %s542_s26, %s651_s27  ;;  %p657_p10 = scmp.lt.s32.totalorder %s651_s27, %s651_s27 }
 0x1ea   :  { %v228_v53 = vmul.f32 %v223_v4, %v786_v42  ;;  %v227_v54 = vmul.f32 %v218_v50, %v781_v35  ;;  %v262_v42 = vpack.c.bf16 %v832_v27, %v827_v22 }
 0x1eb   :  { %p658_p11 = por %p657_p10, %p656_p9 }
 0x1ed   :  { %p659_p12 = pnand %p658_p11, %p652_p8 }
 0x24b   :  { %v232_v46 = vpop.permute.xlu1 %231 }
 0x24c   :  { %v249_v49 = vadd.f32 %v232_v46, %v225_v47 }
 0x24e   :  { %v253_v55 = vmax.f32 %v249_v49, 0.0 }
 0x252   :  { %v237_v51 = vpop.permute.xlu1 %236 }
 0x253   :  { %v250_v52 = vadd.f32 %v237_v51, %v226_v48 }
 0x255   :  { %v254_v56 = vmax.f32 %v250_v52, 0.0 }
 0x256   :  { %v247_v57 = vpop.permute.xlu1 %246  ;;  %v242_v58 = vpop.permute.xlu0 %241 }
 0x257   :  { %v252_v59 = vadd.f32 %v247_v57, %v228_v53  ;;  %v251_v60 = vadd.f32 %v242_v58, %v227_v54  ;;  %v263_v61 = vpack.c.bf16 %v254_v56, %v253_v55 }
 0x259   :  { %v256_v62 = vmax.f32 %v252_v59, 0.0  ;;  %v255_v63 = vmax.f32 %v251_v60, 0.0  ;;  %568 = vmatprep.subr.bf16.mxu0 %v263_v61  ;;  %v687_v59 = vmov 33  }
 0x25a   :  { %569 = vmatpush3.bf16.msra.mxu0 %v263_v61 }
 0x25b   :  { %v264_v35 = vpack.c.bf16 %v256_v62, %v255_v63 }
 0x25d   :  { %570 = vmatprep.subr.bf16.mxu0 %v264_v35 }
 0x25e   :  { %571 = vmatpush3.bf16.msra.mxu0 %v264_v35 }
 0x261   :  { %573 = vmatmul.mubr.msk.bf16.vlgmr.msra.gmra.mrb[0].mxu0 %vm265_vm0, %v262_v42 }
 0x334   :  { %v837_v0 = vpop.f32.mrb[0].mxu0 }
 0x335   :  { %325 = vadd.xlane.f32.xlu0 %v837_v0  ;;  %v840_v1 = vpop.f32.mrb[1].mxu0  ;;  %v331_v10 = vmul.f32 %v837_v0, %v837_v0 }
 0x336   :  { %321 = vadd.xlane.f32.xlu1 %v840_v1  ;;  %v843_v5 = vpop.f32.mrb[2].mxu0  ;;  %v329_v8 = vmul.f32 %v840_v1, %v840_v1 }
 0x337   :  { %v845_v7 = vpop.f32.mrb[3].mxu0  ;;  %v332_v11 = vmul.f32 %v843_v5, %v843_v5 }
 0x338   :  { %v330_v9 = vmul.f32 %v845_v7, %v845_v7 }
 0x339   :  { %323 = vadd.xlane.f32.xlu0 %v845_v7 }
 0x33a   :  { %327 = vadd.xlane.f32.xlu1 %v843_v5 }
 0x33d   :  { %333 = vadd.xlane.f32.xlu0 %v329_v8 }
 0x33e   :  { %335 = vadd.xlane.f32.xlu1 %v330_v9 }
 0x341   :  { %337 = vadd.xlane.f32.xlu0 %v331_v10  ;;  %v449_v10 = vld [vmem:[#allocation2] sm:$0xff] }
 0x342   :  { %339 = vadd.xlane.f32.xlu1 %v332_v11  ;;  %v450_v11 = vld [vmem:[#allocation2 + $0x8] sm:$0xff] }
 0x3c2   :  { %v326_v13 = vpop.xlane.xlu0 %325 }
 0x3c3   :  { %v322_v14 = vpop.xlane.xlu1 %321  ;;  %v343_v20 = vmul.f32 0.0078125, %v326_v13  ;;  %v451_v13 = vld [vmem:[#allocation2 + $0x10] sm:$0xff] }
 0x3c4   :  { %v341_v16 = vmul.f32 0.0078125, %v322_v14  ;;  %v452_v14 = vld [vmem:[#allocation2 + $0x18] sm:$0xff] }
 0x3c5   :  { %v351_v32 = vmul.f32 %v343_v20, %v343_v20 }
 0x3c6   :  { %v324_v15 = vpop.xlane.xlu0 %323  ;;  %v349_v21 = vmul.f32 %v341_v16, %v341_v16 }
 0x3c7   :  { %v328_v17 = vpop.xlane.xlu1 %327  ;;  %v342_v18 = vmul.f32 0.0078125, %v324_v15 }
 0x3c8   :  { %v344_v26 = vmul.f32 0.0078125, %v328_v17 }
 0x3c9   :  { %v350_v25 = vmul.f32 %v342_v18, %v342_v18 }
 0x3ca   :  { %v334_v19 = vpop.xlane.xlu0 %333  ;;  %v352_v37 = vmul.f32 %v344_v26, %v344_v26 }
 0x3cb   :  { %v345_v23 = vmul.f32 0.0078125, %v334_v19  ;;  %v336_v24 = vpop.xlane.xlu1 %335 }
 0x3cc   :  { %v346_v28 = vmul.f32 0.0078125, %v336_v24 }
 0x3cd   :  { %v353_v29 = vsub.f32 %v345_v23, %v349_v21 }
 0x3ce   :  { %v354_v30 = vsub.f32 %v346_v28, %v350_v25  ;;  %v338_v31 = vpop.xlane.xlu0 %337 }
 0x3cf   :  { %v357_v33 = vmax.f32 %v353_v29, 0.0  ;;  %v347_v34 = vmul.f32 0.0078125, %v338_v31  ;;  %v340_v36 = vpop.xlane.xlu1 %339 }
 0x3d0   :  { %v358_v38 = vmax.f32 %v354_v30, 0.0  ;;  %v348_v39 = vmul.f32 0.0078125, %v340_v36 }
 0x3d1   :  { %v361_v40 = vadd.f32 1e-05, %v357_v33  ;;  %v355_v41 = vsub.f32 %v347_v34, %v351_v32 }
 0x3d2   :  { %v362_v43 = vadd.f32 1e-05, %v358_v38  ;;  %v356_v3 = vsub.f32 %v348_v39, %v352_v37 }
 0x3d3   :  { %621 = vrsqrt.f32 %v361_v40  ;;  %v359_v6 = vmax.f32 %v355_v41, 0.0 }
 0x3d4   :  { %623 = vrsqrt.f32 %v362_v43  ;;  %v360_v4 = vmax.f32 %v356_v3, 0.0 }
 0x3d5   :  { %v363_v45 = vadd.f32 1e-05, %v359_v6 }
 0x3d6   :  { %v364_v46 = vadd.f32 1e-05, %v360_v4 }
 0x3d7   :  { %625 = vrsqrt.f32 %v363_v45 }
 0x3d8   :  { %627 = vrsqrt.f32 %v364_v46 }
 0x3dd   :  { %v622_v47 = vpop.eup %621 }
 0x3de   :  { %v624_v48 = vpop.eup %623  ;;  %v369_v49 = vmul.f32 %v622_v47, %v810_v44 }
 0x3df   :  { %v370_v50 = vmul.f32 %v624_v48, %v815_v2 }
 0x3e0   :  { %v373_v51 = vmul.f32 %v369_v49, %v341_v16 }
 0x3e1   :  { %v626_v52 = vpop.eup %625  ;;  %v374_v53 = vmul.f32 %v370_v50, %v342_v18 }
 0x3e2   :  { %v628_v54 = vpop.eup %627  ;;  %381 = vrot.lane.b32.xlu0 %v373_v51, %s684_s0  ;;  %v371_v55 = vmul.f32 %v626_v52, %v827_v22 }
 0x3e3   :  { %383 = vrot.lane.b32.xlu1 %v374_v53, %s684_s0  ;;  %v372_v56 = vmul.f32 %v628_v54, %v832_v27 }
 0x3e4   :  { %v375_v57 = vmul.f32 %v371_v55, %v343_v20 }
 0x3e5   :  { %v376_v58 = vmul.f32 %v372_v56, %v344_v26 }
 0x3e7   :  { %385 = vrot.lane.b32.xlu1 %v375_v57, %s684_s0  ;;  %387 = vrot.lane.b32.xlu0 %v376_v58, %s684_s0 }
 0x3eb   :  { %399 = vperm.xlu1 %607, %v369_v49   ;;  %404 = vperm.xlu0 %608, %v370_v50  }
 0x3ef   :  { %414 = vperm.xlu1 %607, %v372_v56   ;;  %409 = vperm.xlu0 %608, %v371_v55  }
 0x3f3   :  { %610 = vset.pattern.permute.xlu1 %v687_v59  ;;  %609 = vset.pattern.permute.xlu0 %v687_v59 }
 0x454   :  { %v382_v60 = vpop.permute.xlu0 %381 }
 0x455   :  { %v393_v61 = vsub.f32 %v810_v44, %v382_v60  ;;  %v384_v62 = vpop.permute.xlu1 %383  ;;  %v453_v44 = vpack.c.bf16 %v450_v11, %v449_v10 }
 0x456   :  { %v394_v63 = vsub.f32 %v815_v2, %v384_v62  ;;  %v454_v2 = vpack.c.bf16 %v452_v14, %v451_v13 }
 0x457   :  { %423 = vperm.xlu1 %610, %v393_v61   ;;  %580 = vmatprep.mubr.msk.bf16.mxu1 %vm265_vm0, %v453_v44 }
 0x459   :  { %v386_v35 = vpop.permute.xlu1 %385  ;;  %v388_v42 = vpop.permute.xlu0 %387 }
 0x45a   :  { %v395_v8 = vsub.f32 %v827_v22, %v386_v35  ;;  %v396_v9 = vsub.f32 %v832_v27, %v388_v42 }
 0x45b   :  { %428 = vperm.xlu1 %610, %v394_v63  }
 0x45c   :  { %433 = vperm.xlu0 %609, %v395_v8  }
 0x45f   :  { %438 = vperm.xlu1 %610, %v396_v9  }
 0x460   :  { %612 = vset.pattern.permute.xlu0 %v686_v12 }
 0x461   :  { %464 = vperm.xlu0 %612, %v450_v11  }
 0x463   :  { %611 = vset.pattern.permute.xlu1 %v686_v12 }
 0x464   :  { %459 = vperm.xlu1 %611, %v449_v10  }
 0x468   :  { %469 = vperm.xlu1 %611, %v451_v13  }
 0x46a   :  { %v400_v22 = vpop.permute.xlu1 %399  ;;  %v405_v15 = vpop.permute.xlu0 %404 }
 0x46b   :  { %v417_v17 = vmul.f32 %v400_v22, %v840_v1  ;;  %v418_v12 = vmul.f32 %v405_v15, %v845_v7 }
 0x46c   :  { %474 = vperm.xlu1 %611, %v452_v14  }
 0x46e   :  { %v415_v27 = vpop.permute.xlu1 %414  ;;  %v410_v18 = vpop.permute.xlu0 %409 }
 0x46f   :  { %v419_v21 = vmul.f32 %v837_v0, %v410_v18  ;;  %v420_v25 = vmul.f32 %v843_v5, %v415_v27 }
 0x4d6   :  { %v424_v16 = vpop.permute.xlu1 %423 }
 0x4d7   :  { %v441_v19 = vadd.f32 %v424_v16, %v417_v17 }
 0x4d9   :  { %v445_v26 = vmax.f32 %v441_v19, 0.0 }
 0x4da   :  { %v429_v20 = vpop.permute.xlu1 %428 }
 0x4db   :  { %v442_v23 = vadd.f32 %v429_v20, %v418_v12  ;;  %v434_v24 = vpop.permute.xlu0 %433 }
 0x4dc   :  { %v443_v29 = vadd.f32 %v434_v24, %v419_v21 }
 0x4dd   :  { %v446_v28 = vmax.f32 %v442_v23, 0.0 }
 0x4de   :  { %v439_v30 = vpop.permute.xlu1 %438  ;;  %v447_v33 = vmax.f32 %v443_v29, 0.0 }
 0x4df   :  { %v444_v31 = vadd.f32 %v439_v30, %v420_v25  ;;  %v455_v32 = vpack.c.bf16 %v446_v28, %v445_v26 }
 0x4e0   :  { %v465_v38 = vpop.permute.xlu0 %464 }
 0x4e1   :  { %v448_v34 = vmax.f32 %v444_v31, 0.0  ;;  %576 = vmatprep.subr.bf16.mxu1 %v455_v32 }
 0x4e2   :  { %577 = vmatpush3.bf16.msra.mxu1 %v455_v32 }
 0x4e3   :  { %v456_v1 = vpack.c.bf16 %v448_v34, %v447_v33  ;;  %v460_v0 = vpop.permute.xlu1 %459 }
 0x4e5   :  { %578 = vmatprep.subr.bf16.mxu1 %v456_v1 }
 0x4e6   :  { %579 = vmatpush3.bf16.msra.mxu1 %v456_v1 }
 0x4e7   :  { %v470_v7 = vpop.permute.xlu1 %469 }
 0x4e9   :  { %581 = vmatmul.mubr.msk.bf16.vlgmr.msra.gmra.mrb[0].mxu1 %vm265_vm0, %v454_v2 }
 0x4eb   :  { %v475_v39 = vpop.permute.xlu1 %474 }
 0x5bc   :  { %v582_v36 = vpop.f32.mrb[0].mxu1 }
 0x5bd   :  { %v526_v37 = vadd.f32 %v582_v36, %v470_v7  ;;  %v517_v5 = vpop.f32.mrb[1].mxu1 }
 0x5be   :  { %v518_v40 = vadd.f32 %v517_v5, %v460_v0  ;;  %v583_v41 = vpop.f32.mrb[2].mxu1 }
 0x5bf   :  { %534 = vst [vmem:[#allocation5 + $0x10] sm:$0xff] %v526_v37  ;;  %v529_v43 = vadd.f32 %v583_v41, %v475_v39  ;;  %v520_v3 = vpop.f32.mrb[3].mxu1 }
 0x5c0   :  { %532 = vst [vmem:[#allocation5] sm:$0xff] %v518_v40  ;;  %v521_v6 = vadd.f32 %v520_v3, %v465_v38 }
 0x5c1   :  { %535 = vst [vmem:[#allocation5 + $0x18] sm:$0xff] %v529_v43 }
 0x5c2   :  { %533 = vst [vmem:[#allocation5 + $0x8] sm:$0xff] %v521_v6 }
 0x5c3   :  { %662 = shalt.err (!%p659_p12)
}
 0x5c4   :  { %s663_s7 = scalar_lea.hbm %s899_s5, 512 }
 0x5c5   :  { %p664_p13 = scmp.ne.s32.totalorder %s899_s5, %s663_s7  ;;  %p667_p0 = scmp.lt.u32.totalorder %s663_s7, %s899_s5 }
 0x5c7   :  { %p669_p1 = pnand %p667_p0, %p664_p13 }
 0x5c9   :  { %672 = shalt.err (!%p669_p1)
}
 0x5ca   :  { %547 = dma.vmem_to_hbm [thread:$0]  %s542_s26, 512, %s899_s5, [#allocation4], %s678_s28, %s678_s28, %s679_s29  }
 0x5cb   :  { %675 = dma.done.wait [#allocation4], 512  }
 0x5cc   :  { %676 = vsyncadd [#allocation4], 4294966784 }
 0x5cd   :  { %551 = vsyncpa [#allocation3], 1 }
 0x5ce   :  { %552 = vsyncpa [#allocation4], 1 }

</bundles_post_ra>
